<compile_context>
chip_gen: v6e
topology: v6e:2x2x1
jax: 0.10.0
libtpu: 0.0.40
codegen_flags: <defaults>
</compile_context>

<pallas_src>
import functools
import math

import jax
import jax.numpy as jnp
from jax import lax
from jax.experimental import pallas as pl
from jax.experimental.pallas import tpu as pltpu


# ------------------------------ fused kernel --------------------------------

def _mha_kernel(*refs, H, shared_kv):
    if shared_kv:
        (mask_ref, xq_ref, xkv_ref,
         wqkv_ref, bqkv_ref, wo_ref, bo_ref, o_ref, ctx_ref) = refs
    else:
        (mask_ref, xq_ref, xk_ref, xv_ref,
         wqkv_ref, bqkv_ref, wo_ref, bo_ref, o_ref, ctx_ref) = refs

    tq, D = xq_ref.shape
    Dk = D // H
    scale = 1.0 / math.sqrt(Dk)

    wqkv = wqkv_ref[...]                     # (D, 3D) bf16, packed Wq|Wk|Wv
    bqkv = bqkv_ref[...]                     # (1, 3D) f32

    # Q projection for this query tile; fold 1/sqrt(Dk) in here (tq*D mults
    # instead of H*tq*S on the score tiles).
    qp = (jnp.dot(xq_ref[...], wqkv[:, :D], preferred_element_type=jnp.float32)
          + bqkv[:, :D]) * scale                                   # (tq, D) f32

    if shared_kv:
        # key is value: one fused (S, D) @ (D, 2D) projection for K and V.
        kvp = (jnp.dot(xkv_ref[...], wqkv[:, D:],
                       preferred_element_type=jnp.float32) + bqkv[:, D:])
        kp, vp = kvp[:, :D], kvp[:, D:]                            # (S, D) f32
    else:
        kp = jnp.dot(xk_ref[...], wqkv[:, D:2 * D],
                     preferred_element_type=jnp.float32) + bqkv[:, D:2 * D]
        vp = jnp.dot(xv_ref[...], wqkv[:, 2 * D:],
                     preferred_element_type=jnp.float32) + bqkv[:, 2 * D:]

    # bf16 MXU operands for the attention matmuls; softmax math stays f32.
    qb = qp.astype(jnp.bfloat16)
    kb = kp.astype(jnp.bfloat16)
    vb = vp.astype(jnp.bfloat16)

    # Additive mask bias (0 / -1e9) built in-kernel from the tiny mask block.
    bias = jnp.where(mask_ref[...] == 0.0,
                     jnp.float32(-1e9), jnp.float32(0.0))          # (1|tq, S)

    # Per-head attention via static lane slices (H is small -> unrolled).
    for h in range(H):
        lo, hi = h * Dk, (h + 1) * Dk
        # Contract the last dims of q and k: no explicit (S, Dk) transpose.
        s = lax.dot_general(qb[:, lo:hi], kb[:, lo:hi],
                            (((1,), (1,)), ((), ())),
                            preferred_element_type=jnp.float32)    # (tq, S)
        s = s + bias
        s = s - jnp.max(s, axis=-1, keepdims=True)
        e = jnp.exp(s)
        p = e * pl.reciprocal(jnp.sum(e, axis=-1, keepdims=True), approx=True)
        # (dropout on p is identity in eval mode)
        ctx_ref[:, lo:hi] = jnp.dot(p.astype(jnp.bfloat16), vb[:, lo:hi],
                                    preferred_element_type=jnp.float32)

    # Single full-K output projection (tq, D) @ (D, D).
    out = jnp.dot(ctx_ref[...].astype(jnp.bfloat16), wo_ref[...],
                  preferred_element_type=jnp.float32) + bo_ref[...]
    o_ref[...] = out.astype(o_ref.dtype)


def multi_head_attention(query, key, value, wqkv, bqkv, wo, bo, mask=None,
                         *, H, tq=None):
    """query: (B, Sq, D); key/value: (B, Skv, D); mask: (B,1,Skv)/(B,Sq,Skv)."""
    B, Sq, D = query.shape
    Skv = key.shape[1]
    assert D % H == 0
    assert value.shape[1] == Skv

    # Query tile size (tune per generation: 256 v6e/v7x, 128 v5e).
    if tq is None:
        tq = Sq
        for cand in (256, 128, 64, 32, 16, 8):
            if Sq % cand == 0:
                tq = cand
                break
    assert Sq % tq == 0

    shared_kv = key is value                  # self- / memory-attention dedup

    # Raw mask (no (B, S, S) bias materialization); bias is built in-kernel.
    if mask is None:
        mask = jnp.ones((B, 1, Skv), jnp.float32)
    mask = mask.astype(jnp.float32)
    if mask.ndim == 2:
        mask = mask[:, None, :]
    Mq = mask.shape[1]
    assert Mq in (1, Sq)
    mask = jnp.broadcast_to(mask, (B, Mq, Skv))

    # bf16 MXU operands; biases stay f32 (added post-matmul).
    q_bf = query.astype(jnp.bfloat16)
    k_bf = q_bf if key is query else key.astype(jnp.bfloat16)
    v_bf = k_bf if value is key else value.astype(jnp.bfloat16)
    wqkv_bf = wqkv.astype(jnp.bfloat16)
    wo_bf = wo.astype(jnp.bfloat16)
    bqkv_f = bqkv.astype(jnp.float32).reshape(1, 3 * D)
    bo_f = bo.astype(jnp.float32).reshape(1, D)

    if Mq == 1:
        mask_spec = pl.BlockSpec((None, 1, Skv), lambda b, qi: (b, 0, 0))
    else:
        mask_spec = pl.BlockSpec((None, tq, Skv), lambda b, qi: (b, qi, 0))
    q_spec = pl.BlockSpec((None, tq, D), lambda b, qi: (b, qi, 0))
    kv_spec = pl.BlockSpec((None, Skv, D), lambda b, qi: (b, 0, 0))
    w_specs = [
        pl.BlockSpec((D, 3 * D), lambda b, qi: (0, 0)),   # packed Wqkv (bf16)
        pl.BlockSpec((1, 3 * D), lambda b, qi: (0, 0)),   # packed bqkv (f32)
        pl.BlockSpec((D, D), lambda b, qi: (0, 0)),       # Wo (bf16)
        pl.BlockSpec((1, D), lambda b, qi: (0, 0)),       # bo (f32)
    ]

    if shared_kv:
        data = (mask, q_bf, k_bf)
        data_specs = [mask_spec, q_spec, kv_spec]
    else:
        data = (mask, q_bf, k_bf, v_bf)
        data_specs = [mask_spec, q_spec, kv_spec, kv_spec]

    kernel = functools.partial(_mha_kernel, H=H, shared_kv=shared_kv)
    return pl.pallas_call(
        kernel,
        out_shape=jax.ShapeDtypeStruct((B, Sq, D), query.dtype),
        grid=(B, Sq // tq),
        in_specs=data_specs + w_specs,
        out_specs=pl.BlockSpec((None, tq, D), lambda b, qi: (b, qi, 0)),
        scratch_shapes=[pltpu.VMEM((tq, D), jnp.float32)],   # per-tile context
        compiler_params=pltpu.CompilerParams(
            dimension_semantics=("parallel", "parallel"),
            vmem_limit_bytes=48 * 1024 * 1024),
    )(*data, wqkv_bf, bqkv_f, wo_bf, bo_f)


# --------------------------- pure-JAX reference ------------------------------

def mha_reference(q, k, v, wqkv, bqkv, wo, bo, mask, H):
    """Reference mirroring the kernel's bf16-operand / f32-accumulate math."""
    f32, bf16 = jnp.float32, jnp.bfloat16
    B, Sq, D = q.shape
    Dk = D // H
    scale = 1.0 / math.sqrt(Dk)

    def c(x):                                  # bf16 round-trip (MXU operand)
        return x.astype(bf16).astype(f32)

    qb, kb, vb = c(q), c(k), c(v)
    wq, wk, wv = (c(wqkv[:, i * D:(i + 1) * D]) for i in range(3))
    bq, bk, bv = (bqkv[:, i * D:(i + 1) * D].astype(f32) for i in range(3))

    qp = c((qb @ wq + bq) * scale)
    kp = c(kb @ wk + bk)
    vp = c(vb @ wv + bv)

    def split(x):
        return x.reshape(B, -1, H, Dk).transpose(0, 2, 1, 3)   # (B,H,S,Dk)

    Q, K, V = split(qp), split(kp), split(vp)
    s = jnp.einsum('bhqd,bhkd->bhqk', Q, K)
    if mask is not None:
        m = mask if mask.ndim == 3 else mask[:, None, :]
        s = s + jnp.where(m[:, None, :, :] == 0, -1e9, 0.0)
    p = c(jax.nn.softmax(s, axis=-1))
    ctx = jnp.einsum('bhqk,bhkd->bhqd', p, V)
    ctx = c(ctx.transpose(0, 2, 1, 3).reshape(B, Sq, D))
    return ctx @ c(wo) + bo.astype(f32)


# --------------------------------- main --------------------------------------

if __name__ == "__main__":
    B, S, D, H = 2, 16, 32, 4
    key = jax.random.PRNGKey(0)
    kx, k0, k1, k2, k3, k4, k5 = jax.random.split(key, 7)

    x = jax.random.normal(kx, (B, S, D), jnp.float32)         # self-attention
    std = 1.0 / math.sqrt(D)
    wq = std * jax.random.normal(k0, (D, D), jnp.float32)
    wk = std * jax.random.normal(k1, (D, D), jnp.float32)
    wv = std * jax.random.normal(k2, (D, D), jnp.float32)
    wo = std * jax.random.normal(k3, (D, D), jnp.float32)
    wqkv = jnp.concatenate([wq, wk, wv], axis=1)              # (D, 3D)
    bqkv = 0.1 * jax.random.normal(k4, (1, 3 * D), jnp.float32)
    bo = 0.1 * jax.random.normal(k5, (1, D), jnp.float32)

    mask = jnp.ones((B, 1, S), jnp.float32)
    mask = mask.at[1, 0, S - 3:].set(0.0)     # mask last 3 key slots, batch 1

    out = multi_head_attention(x, x, x, wqkv, bqkv, wo, bo, mask, H=H, tq=8)
    out = jax.block_until_ready(out)

    ref = mha_reference(x, x, x, wqkv, bqkv, wo, bo, mask, H)
    assert out.shape == (B, S, D) and out.dtype == jnp.float32
    err = float(jnp.max(jnp.abs(out - ref)))
    assert jnp.allclose(out, ref, atol=2e-2, rtol=2e-2), f"max abs err {err}"
    print("KERNEL_OK")
</pallas_src>

<mosaic_0001>
module attributes {stable_mosaic.version = 11 : i64} {
  func.func @_mha_kernel(%arg0: i32, %arg1: i32, %arg2: memref<1x1x16xf32, #tpu.memory_space<vmem>>, %arg3: memref<1x8x32xbf16, #tpu.memory_space<vmem>>, %arg4: memref<1x16x32xbf16, #tpu.memory_space<vmem>>, %arg5: memref<32x96xbf16, #tpu.memory_space<vmem>>, %arg6: memref<1x96xf32, #tpu.memory_space<vmem>>, %arg7: memref<32x32xbf16, #tpu.memory_space<vmem>>, %arg8: memref<1x32xf32, #tpu.memory_space<vmem>>, %arg9: memref<1x8x32xf32, #tpu.memory_space<vmem>>, %arg10: memref<8x32xf32, #tpu.memory_space<vmem>>) attributes {dimension_semantics = [#tpu.dimension_semantics<parallel>, #tpu.dimension_semantics<parallel>], iteration_bounds = array<i64: 2, 2>, scalar_prefetch = 0 : i64, scratch_operands = 1 : i64, tpu.core_type = #tpu.core_type<tc>, window_params = [{transform_indices = @transform_0, window_bounds = array<i64: 1, 1, 16>}, {transform_indices = @transform_1, window_bounds = array<i64: 1, 8, 32>}, {transform_indices = @transform_2, window_bounds = array<i64: 1, 16, 32>}, {pipeline_mode = #tpu.pipeline_mode<synchronous>, transform_indices = @transform_3, window_bounds = array<i64: 32, 96>}, {pipeline_mode = #tpu.pipeline_mode<synchronous>, transform_indices = @transform_4, window_bounds = array<i64: 1, 96>}, {pipeline_mode = #tpu.pipeline_mode<synchronous>, transform_indices = @transform_5, window_bounds = array<i64: 32, 32>}, {pipeline_mode = #tpu.pipeline_mode<synchronous>, transform_indices = @transform_6, window_bounds = array<i64: 1, 32>}, {transform_indices = @transform_7, window_bounds = array<i64: 1, 8, 32>}]} {
    %c0 = arith.constant 0 : index
    %c0_0 = arith.constant 0 : index
    %0 = vector.load %arg5[%c0, %c0_0] : memref<32x96xbf16, #tpu.memory_space<vmem>>, vector<32x96xbf16>
    %c0_1 = arith.constant 0 : index
    %c0_2 = arith.constant 0 : index
    %1 = vector.load %arg6[%c0_1, %c0_2] : memref<1x96xf32, #tpu.memory_space<vmem>>, vector<1x96xf32>
    %c0_3 = arith.constant 0 : index
    %c0_4 = arith.constant 0 : index
    %c0_5 = arith.constant 0 : index
    %2 = vector.load %arg3[%c0_3, %c0_4, %c0_5] : memref<1x8x32xbf16, #tpu.memory_space<vmem>>, vector<1x8x32xbf16>
    %3 = vector.shape_cast %2 : vector<1x8x32xbf16> to vector<8x32xbf16>
    %4 = vector.extract_strided_slice %0 {offsets = [0, 0], sizes = [32, 32], strides = [1, 1]} : vector<32x96xbf16> to vector<32x32xbf16>
    %cst = arith.constant dense<0.000000e+00> : vector<8x32xf32>
    %5 = tpu.matmul %3, %4, %cst {dimension_numbers = #tpu.dot_dimension_numbers<[1], [0], [0], [1], [0, 0, 1, 1], [], []>} : vector<8x32xbf16>, vector<32x32xbf16>, vector<8x32xf32> -> vector<8x32xf32>
    %6 = vector.extract_strided_slice %1 {offsets = [0, 0], sizes = [1, 32], strides = [1, 1]} : vector<1x96xf32> to vector<1x32xf32>
    %7 = vector.broadcast %6 : vector<1x32xf32> to vector<8x32xf32>
    %8 = arith.addf %5, %7 : vector<8x32xf32>
    %cst_6 = arith.constant 0.353553385 : f32
    %9 = vector.broadcast %cst_6 : f32 to vector<8x32xf32>
    %10 = arith.mulf %8, %9 : vector<8x32xf32>
    %c0_7 = arith.constant 0 : index
    %c0_8 = arith.constant 0 : index
    %c0_9 = arith.constant 0 : index
    %11 = vector.load %arg4[%c0_7, %c0_8, %c0_9] : memref<1x16x32xbf16, #tpu.memory_space<vmem>>, vector<1x16x32xbf16>
    %12 = vector.shape_cast %11 : vector<1x16x32xbf16> to vector<16x32xbf16>
    %13 = vector.extract_strided_slice %0 {offsets = [0, 32], sizes = [32, 64], strides = [1, 1]} : vector<32x96xbf16> to vector<32x64xbf16>
    %cst_10 = arith.constant dense<0.000000e+00> : vector<16x64xf32>
    %14 = tpu.matmul %12, %13, %cst_10 {dimension_numbers = #tpu.dot_dimension_numbers<[1], [0], [0], [1], [0, 0, 1, 1], [], []>} : vector<16x32xbf16>, vector<32x64xbf16>, vector<16x64xf32> -> vector<16x64xf32>
    %15 = vector.extract_strided_slice %1 {offsets = [0, 32], sizes = [1, 64], strides = [1, 1]} : vector<1x96xf32> to vector<1x64xf32>
    %16 = vector.broadcast %15 : vector<1x64xf32> to vector<16x64xf32>
    %17 = arith.addf %14, %16 : vector<16x64xf32>
    %18 = vector.extract_strided_slice %17 {offsets = [0, 0], sizes = [16, 32], strides = [1, 1]} : vector<16x64xf32> to vector<16x32xf32>
    %19 = vector.extract_strided_slice %17 {offsets = [0, 32], sizes = [16, 32], strides = [1, 1]} : vector<16x64xf32> to vector<16x32xf32>
    %20 = arith.truncf %10 : vector<8x32xf32> to vector<8x32xbf16>
    %21 = arith.truncf %18 : vector<16x32xf32> to vector<16x32xbf16>
    %22 = arith.truncf %19 : vector<16x32xf32> to vector<16x32xbf16>
    %c0_11 = arith.constant 0 : index
    %c0_12 = arith.constant 0 : index
    %c0_13 = arith.constant 0 : index
    %23 = vector.load %arg2[%c0_11, %c0_12, %c0_13] : memref<1x1x16xf32, #tpu.memory_space<vmem>>, vector<1x1x16xf32>
    %24 = vector.shape_cast %23 : vector<1x1x16xf32> to vector<1x16xf32>
    %cst_14 = arith.constant 0.000000e+00 : f32
    %25 = vector.broadcast %cst_14 : f32 to vector<1x16xf32>
    %26 = arith.cmpf oeq, %24, %25 : vector<1x16xf32>
    %cst_15 = arith.constant -1.000000e+09 : f32
    %cst_16 = arith.constant 0.000000e+00 : f32
    %27 = vector.broadcast %cst_15 : f32 to vector<1x16xf32>
    %28 = vector.broadcast %cst_16 : f32 to vector<1x16xf32>
    %29 = arith.select %26, %27, %28 : vector<1x16xi1>, vector<1x16xf32>
    %30 = vector.extract_strided_slice %20 {offsets = [0, 0], sizes = [8, 8], strides = [1, 1]} : vector<8x32xbf16> to vector<8x8xbf16>
    %31 = vector.extract_strided_slice %21 {offsets = [0, 0], sizes = [16, 8], strides = [1, 1]} : vector<16x32xbf16> to vector<16x8xbf16>
    %cst_17 = arith.constant dense<0.000000e+00> : vector<8x16xf32>
    %32 = tpu.matmul %30, %31, %cst_17 {dimension_numbers = #tpu.dot_dimension_numbers<[1], [1], [0], [0], [0, 0, 1, 0], [], []>} : vector<8x8xbf16>, vector<16x8xbf16>, vector<8x16xf32> -> vector<8x16xf32>
    %33 = vector.broadcast %29 : vector<1x16xf32> to vector<8x16xf32>
    %34 = arith.addf %32, %33 : vector<8x16xf32>
    %cst_18 = arith.constant dense<0xFF800000> : vector<8xf32>
    %35 = vector.multi_reduction <maximumf>, %34, %cst_18 [1] : vector<8x16xf32> to vector<8xf32>
    %36 = vector.shape_cast %35 : vector<8xf32> to vector<8x1xf32>
    %37 = vector.broadcast %36 : vector<8x1xf32> to vector<8x16xf32>
    %38 = arith.subf %34, %37 : vector<8x16xf32>
    %39 = math.exp %38 : vector<8x16xf32>
    %cst_19 = arith.constant dense<0.000000e+00> : vector<8xf32>
    %40 = vector.multi_reduction <add>, %39, %cst_19 [1] : vector<8x16xf32> to vector<8xf32>
    %41 = vector.shape_cast %40 : vector<8xf32> to vector<8x1xf32>
    %42 = tpu.reciprocal %41 {approx = true} : vector<8x1xf32> -> vector<8x1xf32>
    %43 = vector.broadcast %42 : vector<8x1xf32> to vector<8x16xf32>
    %44 = arith.mulf %39, %43 : vector<8x16xf32>
    %45 = arith.truncf %44 : vector<8x16xf32> to vector<8x16xbf16>
    %46 = vector.extract_strided_slice %22 {offsets = [0, 0], sizes = [16, 8], strides = [1, 1]} : vector<16x32xbf16> to vector<16x8xbf16>
    %cst_20 = arith.constant dense<0.000000e+00> : vector<8x8xf32>
    %47 = tpu.matmul %45, %46, %cst_20 {dimension_numbers = #tpu.dot_dimension_numbers<[1], [0], [0], [1], [0, 0, 1, 1], [], []>} : vector<8x16xbf16>, vector<16x8xbf16>, vector<8x8xf32> -> vector<8x8xf32>
    %c0_21 = arith.constant 0 : index
    %c0_22 = arith.constant 0 : index
    %48 = vector.load %arg10[%c0_21, %c0_22] : memref<8x32xf32, #tpu.memory_space<vmem>>, vector<8x8xf32>
    tpu.vector_store %arg10[%c0_21, %c0_22], %47 {strides = array<i32>} : memref<8x32xf32, #tpu.memory_space<vmem>>, vector<8x8xf32>,
    %49 = vector.extract_strided_slice %20 {offsets = [0, 8], sizes = [8, 8], strides = [1, 1]} : vector<8x32xbf16> to vector<8x8xbf16>
    %50 = vector.extract_strided_slice %21 {offsets = [0, 8], sizes = [16, 8], strides = [1, 1]} : vector<16x32xbf16> to vector<16x8xbf16>
    %cst_23 = arith.constant dense<0.000000e+00> : vector<8x16xf32>
    %51 = tpu.matmul %49, %50, %cst_23 {dimension_numbers = #tpu.dot_dimension_numbers<[1], [1], [0], [0], [0, 0, 1, 0], [], []>} : vector<8x8xbf16>, vector<16x8xbf16>, vector<8x16xf32> -> vector<8x16xf32>
    %52 = vector.broadcast %29 : vector<1x16xf32> to vector<8x16xf32>
    %53 = arith.addf %51, %52 : vector<8x16xf32>
    %cst_24 = arith.constant dense<0xFF800000> : vector<8xf32>
    %54 = vector.multi_reduction <maximumf>, %53, %cst_24 [1] : vector<8x16xf32> to vector<8xf32>
    %55 = vector.shape_cast %54 : vector<8xf32> to vector<8x1xf32>
    %56 = vector.broadcast %55 : vector<8x1xf32> to vector<8x16xf32>
    %57 = arith.subf %53, %56 : vector<8x16xf32>
    %58 = math.exp %57 : vector<8x16xf32>
    %cst_25 = arith.constant dense<0.000000e+00> : vector<8xf32>
    %59 = vector.multi_reduction <add>, %58, %cst_25 [1] : vector<8x16xf32> to vector<8xf32>
    %60 = vector.shape_cast %59 : vector<8xf32> to vector<8x1xf32>
    %61 = tpu.reciprocal %60 {approx = true} : vector<8x1xf32> -> vector<8x1xf32>
    %62 = vector.broadcast %61 : vector<8x1xf32> to vector<8x16xf32>
    %63 = arith.mulf %58, %62 : vector<8x16xf32>
    %64 = arith.truncf %63 : vector<8x16xf32> to vector<8x16xbf16>
    %65 = vector.extract_strided_slice %22 {offsets = [0, 8], sizes = [16, 8], strides = [1, 1]} : vector<16x32xbf16> to vector<16x8xbf16>
    %cst_26 = arith.constant dense<0.000000e+00> : vector<8x8xf32>
    %66 = tpu.matmul %64, %65, %cst_26 {dimension_numbers = #tpu.dot_dimension_numbers<[1], [0], [0], [1], [0, 0, 1, 1], [], []>} : vector<8x16xbf16>, vector<16x8xbf16>, vector<8x8xf32> -> vector<8x8xf32>
    %c0_27 = arith.constant 0 : index
    %c8 = arith.constant 8 : index
    %67 = vector.load %arg10[%c0_27, %c8] : memref<8x32xf32, #tpu.memory_space<vmem>>, vector<8x8xf32>
    tpu.vector_store %arg10[%c0_27, %c8], %66 {strides = array<i32>} : memref<8x32xf32, #tpu.memory_space<vmem>>, vector<8x8xf32>,
    %68 = vector.extract_strided_slice %20 {offsets = [0, 16], sizes = [8, 8], strides = [1, 1]} : vector<8x32xbf16> to vector<8x8xbf16>
    %69 = vector.extract_strided_slice %21 {offsets = [0, 16], sizes = [16, 8], strides = [1, 1]} : vector<16x32xbf16> to vector<16x8xbf16>
    %cst_28 = arith.constant dense<0.000000e+00> : vector<8x16xf32>
    %70 = tpu.matmul %68, %69, %cst_28 {dimension_numbers = #tpu.dot_dimension_numbers<[1], [1], [0], [0], [0, 0, 1, 0], [], []>} : vector<8x8xbf16>, vector<16x8xbf16>, vector<8x16xf32> -> vector<8x16xf32>
    %71 = vector.broadcast %29 : vector<1x16xf32> to vector<8x16xf32>
    %72 = arith.addf %70, %71 : vector<8x16xf32>
    %cst_29 = arith.constant dense<0xFF800000> : vector<8xf32>
    %73 = vector.multi_reduction <maximumf>, %72, %cst_29 [1] : vector<8x16xf32> to vector<8xf32>
    %74 = vector.shape_cast %73 : vector<8xf32> to vector<8x1xf32>
    %75 = vector.broadcast %74 : vector<8x1xf32> to vector<8x16xf32>
    %76 = arith.subf %72, %75 : vector<8x16xf32>
    %77 = math.exp %76 : vector<8x16xf32>
    %cst_30 = arith.constant dense<0.000000e+00> : vector<8xf32>
    %78 = vector.multi_reduction <add>, %77, %cst_30 [1] : vector<8x16xf32> to vector<8xf32>
    %79 = vector.shape_cast %78 : vector<8xf32> to vector<8x1xf32>
    %80 = tpu.reciprocal %79 {approx = true} : vector<8x1xf32> -> vector<8x1xf32>
    %81 = vector.broadcast %80 : vector<8x1xf32> to vector<8x16xf32>
    %82 = arith.mulf %77, %81 : vector<8x16xf32>
    %83 = arith.truncf %82 : vector<8x16xf32> to vector<8x16xbf16>
    %84 = vector.extract_strided_slice %22 {offsets = [0, 16], sizes = [16, 8], strides = [1, 1]} : vector<16x32xbf16> to vector<16x8xbf16>
    %cst_31 = arith.constant dense<0.000000e+00> : vector<8x8xf32>
    %85 = tpu.matmul %83, %84, %cst_31 {dimension_numbers = #tpu.dot_dimension_numbers<[1], [0], [0], [1], [0, 0, 1, 1], [], []>} : vector<8x16xbf16>, vector<16x8xbf16>, vector<8x8xf32> -> vector<8x8xf32>
    %c0_32 = arith.constant 0 : index
    %c16 = arith.constant 16 : index
    %86 = vector.load %arg10[%c0_32, %c16] : memref<8x32xf32, #tpu.memory_space<vmem>>, vector<8x8xf32>
    tpu.vector_store %arg10[%c0_32, %c16], %85 {strides = array<i32>} : memref<8x32xf32, #tpu.memory_space<vmem>>, vector<8x8xf32>,
    %87 = vector.extract_strided_slice %20 {offsets = [0, 24], sizes = [8, 8], strides = [1, 1]} : vector<8x32xbf16> to vector<8x8xbf16>
    %88 = vector.extract_strided_slice %21 {offsets = [0, 24], sizes = [16, 8], strides = [1, 1]} : vector<16x32xbf16> to vector<16x8xbf16>
    %cst_33 = arith.constant dense<0.000000e+00> : vector<8x16xf32>
    %89 = tpu.matmul %87, %88, %cst_33 {dimension_numbers = #tpu.dot_dimension_numbers<[1], [1], [0], [0], [0, 0, 1, 0], [], []>} : vector<8x8xbf16>, vector<16x8xbf16>, vector<8x16xf32> -> vector<8x16xf32>
    %90 = vector.broadcast %29 : vector<1x16xf32> to vector<8x16xf32>
    %91 = arith.addf %89, %90 : vector<8x16xf32>
    %cst_34 = arith.constant dense<0xFF800000> : vector<8xf32>
    %92 = vector.multi_reduction <maximumf>, %91, %cst_34 [1] : vector<8x16xf32> to vector<8xf32>
    %93 = vector.shape_cast %92 : vector<8xf32> to vector<8x1xf32>
    %94 = vector.broadcast %93 : vector<8x1xf32> to vector<8x16xf32>
    %95 = arith.subf %91, %94 : vector<8x16xf32>
    %96 = math.exp %95 : vector<8x16xf32>
    %cst_35 = arith.constant dense<0.000000e+00> : vector<8xf32>
    %97 = vector.multi_reduction <add>, %96, %cst_35 [1] : vector<8x16xf32> to vector<8xf32>
    %98 = vector.shape_cast %97 : vector<8xf32> to vector<8x1xf32>
    %99 = tpu.reciprocal %98 {approx = true} : vector<8x1xf32> -> vector<8x1xf32>
    %100 = vector.broadcast %99 : vector<8x1xf32> to vector<8x16xf32>
    %101 = arith.mulf %96, %100 : vector<8x16xf32>
    %102 = arith.truncf %101 : vector<8x16xf32> to vector<8x16xbf16>
    %103 = vector.extract_strided_slice %22 {offsets = [0, 24], sizes = [16, 8], strides = [1, 1]} : vector<16x32xbf16> to vector<16x8xbf16>
    %cst_36 = arith.constant dense<0.000000e+00> : vector<8x8xf32>
    %104 = tpu.matmul %102, %103, %cst_36 {dimension_numbers = #tpu.dot_dimension_numbers<[1], [0], [0], [1], [0, 0, 1, 1], [], []>} : vector<8x16xbf16>, vector<16x8xbf16>, vector<8x8xf32> -> vector<8x8xf32>
    %c0_37 = arith.constant 0 : index
    %c24 = arith.constant 24 : index
    %105 = vector.load %arg10[%c0_37, %c24] : memref<8x32xf32, #tpu.memory_space<vmem>>, vector<8x8xf32>
    tpu.vector_store %arg10[%c0_37, %c24], %104 {strides = array<i32>} : memref<8x32xf32, #tpu.memory_space<vmem>>, vector<8x8xf32>,
    %c0_38 = arith.constant 0 : index
    %c0_39 = arith.constant 0 : index
    %106 = vector.load %arg10[%c0_38, %c0_39] : memref<8x32xf32, #tpu.memory_space<vmem>>, vector<8x32xf32>
    %107 = arith.truncf %106 : vector<8x32xf32> to vector<8x32xbf16>
    %c0_40 = arith.constant 0 : index
    %c0_41 = arith.constant 0 : index
    %108 = vector.load %arg7[%c0_40, %c0_41] : memref<32x32xbf16, #tpu.memory_space<vmem>>, vector<32x32xbf16>
    %cst_42 = arith.constant dense<0.000000e+00> : vector<8x32xf32>
    %109 = tpu.matmul %107, %108, %cst_42 {dimension_numbers = #tpu.dot_dimension_numbers<[1], [0], [0], [1], [0, 0, 1, 1], [], []>} : vector<8x32xbf16>, vector<32x32xbf16>, vector<8x32xf32> -> vector<8x32xf32>
    %c0_43 = arith.constant 0 : index
    %c0_44 = arith.constant 0 : index
    %110 = vector.load %arg8[%c0_43, %c0_44] : memref<1x32xf32, #tpu.memory_space<vmem>>, vector<1x32xf32>
    %111 = vector.broadcast %110 : vector<1x32xf32> to vector<8x32xf32>
    %112 = arith.addf %109, %111 : vector<8x32xf32>
    %c0_45 = arith.constant 0 : index
    %c0_46 = arith.constant 0 : index
    %c0_47 = arith.constant 0 : index
    %113 = vector.load %arg9[%c0_45, %c0_46, %c0_47] : memref<1x8x32xf32, #tpu.memory_space<vmem>>, vector<1x8x32xf32>
    %114 = vector.shape_cast %113 : vector<1x8x32xf32> to vector<8x32xf32>
    %115 = vector.shape_cast %112 : vector<8x32xf32> to vector<1x8x32xf32>
    tpu.vector_store %arg9[%c0_45, %c0_46, %c0_47], %115 {strides = array<i32>} : memref<1x8x32xf32, #tpu.memory_space<vmem>>, vector<1x8x32xf32>,
    return
  }
  func.func @transform_0(%arg0: i32, %arg1: i32) -> (i32, i32, i32) {
    %c0_i32 = arith.constant 0 : i32
    %c0_i32_0 = arith.constant 0 : i32
    %c0_i32_1 = arith.constant 0 : i32
    return %arg0, %c0_i32, %c0_i32_0 : i32, i32, i32
  }
  func.func @transform_1(%arg0: i32, %arg1: i32) -> (i32, i32, i32) {
    %c0_i32 = arith.constant 0 : i32
    %c0_i32_0 = arith.constant 0 : i32
    return %arg0, %arg1, %c0_i32 : i32, i32, i32
  }
  func.func @transform_2(%arg0: i32, %arg1: i32) -> (i32, i32, i32) {
    %c0_i32 = arith.constant 0 : i32
    %c0_i32_0 = arith.constant 0 : i32
    %c0_i32_1 = arith.constant 0 : i32
    return %arg0, %c0_i32, %c0_i32_0 : i32, i32, i32
  }
  func.func @transform_3(%arg0: i32, %arg1: i32) -> (i32, i32) {
    %c0_i32 = arith.constant 0 : i32
    %c0_i32_0 = arith.constant 0 : i32
    %c0_i32_1 = arith.constant 0 : i32
    return %c0_i32, %c0_i32_0 : i32, i32
  }
  func.func @transform_4(%arg0: i32, %arg1: i32) -> (i32, i32) {
    %c0_i32 = arith.constant 0 : i32
    %c0_i32_0 = arith.constant 0 : i32
    %c0_i32_1 = arith.constant 0 : i32
    return %c0_i32, %c0_i32_0 : i32, i32
  }
  func.func @transform_5(%arg0: i32, %arg1: i32) -> (i32, i32) {
    %c0_i32 = arith.constant 0 : i32
    %c0_i32_0 = arith.constant 0 : i32
    %c0_i32_1 = arith.constant 0 : i32
    return %c0_i32, %c0_i32_0 : i32, i32
  }
  func.func @transform_6(%arg0: i32, %arg1: i32) -> (i32, i32) {
    %c0_i32 = arith.constant 0 : i32
    %c0_i32_0 = arith.constant 0 : i32
    %c0_i32_1 = arith.constant 0 : i32
    return %c0_i32, %c0_i32_0 : i32, i32
  }
  func.func @transform_7(%arg0: i32, %arg1: i32) -> (i32, i32, i32) {
    %c0_i32 = arith.constant 0 : i32
    %c0_i32_0 = arith.constant 0 : i32
    return %arg0, %arg1, %c0_i32 : i32, i32, i32
  }
}

</mosaic_0001>

<bundles_post_ra>
// kernel: tpu_custom_call.1
= control target key start
LH: loop header
LB: loop body
LE: loop exit
PB: predicated region body
PF: predicated region fallthrough
CT: control target
= control target key end

     0   :  { %s2267_s0 = inlined_call_operand.hbm [shape: f32[2,1,16], index: 0, kind: input, shape index: {}]   ;;  %s2268_s1 = inlined_call_operand.hbm [shape: bf16[2,16,32], index: 1, kind: input, shape index: {}]   ;;  %s2269_s2 = inlined_call_operand.hbm [shape: bf16[2,16,32], index: 2, kind: input, shape index: {}]   ;;  %s2270_s3 = inlined_call_operand.hbm [shape: bf16[32,96], index: 3, kind: input, shape index: {}]   ;;  %s2271_s4 = inlined_call_operand.vmem [shape: f32[1,96], index: 4, kind: input, shape index: {}]   ;;  %s2272_s5 = inlined_call_operand.hbm [shape: bf16[32,32], index: 5, kind: input, shape index: {}]   ;;  %s2273_s6 = inlined_call_operand.vmem [shape: f32[1,32], index: 6, kind: input, shape index: {}]   ;;  %s2274_s7 = inlined_call_operand.hbm [shape: f32[2,16,32], index: 7, kind: output, shape index: {}]  }
   0x1   :  { %2296 = sst [smem:[#allocation27_spill]] %s2267_s0 }
   0x2   :  { %2297 = sst [smem:[#allocation28_spill]] %s2268_s1 }
   0x3   :  { %2298 = sst [smem:[#allocation29_spill]] %s2270_s3 }
   0x4   :  { %2299 = sst [smem:[#allocation30_spill]] %s2271_s4 }
   0x5   :  { %2300 = sst [smem:[#allocation31_spill]] %s2273_s6 }
   0x6   :  { %2301 = sst [smem:[#allocation32_spill]] %s2274_s7 }
   0x7   :  { %12 = vsyncpa [#allocation4], 0 }
   0x8   :  { %14 = vsyncpa [#allocation4 + $0x1], 0 }
   0x9   :  { %15 = vsyncpa [#allocation7], 0 }
   0xa   :  { %17 = vsyncpa [#allocation7 + $0x1], 0 }
   0xb   :  { %18 = vsyncpa [#allocation10], 0 }
   0xc   :  { %19 = vsyncpa [#allocation5], 0 }
   0xd   :  { %21 = vsyncpa [#allocation5 + $0x1], 0  ;;  %s1871_s24 = smov 0   ;;  %s1873_s25 = smov 0  }
   0xe   :  { %s1875_s26 = smov 0   ;;  %s1877_s27 = smov 0  }
   0xf   :  { %s1879_s28 = smov 0   ;;  %s1881_s29 = smov 0  }
  0x10   :  { %s1883_s30 = smov 0   ;;  %s1885_s8 = smov 0  }
  0x11   :  { %s1887_s9 = smov 0   ;;  %s1889_s10 = smov 0  }
  0x12   :  { %s1891_s11 = smov 0  }
  0x13 LB: > { %2302 = sst [smem:[#allocation18_spill]] %s1769_s24  ;;  %s1927_s12 = sadd.s32 4294967295, %s1809_s11   ;;  %s1809_s11 = sphi %s1891_s11, %s27_s11   ;;  %s1805_s10 = sphi %s1889_s10, %s2360_s10   ;;  %s1801_s9 = sphi %s1887_s9, %s2359_s9   ;;  %s1797_s8 = sphi %s1885_s8, %s2358_s8   ;;  %s1793_s30 = sphi %s1883_s30, %s2357_s30   ;;  %s1789_s29 = sphi %s1881_s29, %s2356_s29   ;;  %s1785_s28 = sphi %s1879_s28, %s2355_s28   ;;  %s1781_s27 = sphi %s1877_s27, %s2354_s27   ;;  %s1777_s26 = sphi %s1875_s26, %s2353_s26   ;;  %s1773_s25 = sphi %s1873_s25, %s2352_s25   ;;  %s1769_s24 = sphi %s1871_s24, %s2351_s24  }
  0x14   : > { %2303 = sst [smem:[#allocation19_spill]] %s1773_s25  ;;  %p1235_p0 = scmp.ge.s32.totalorder %s1809_s11, 1 }
  0x15   : > { %2304 = sst [smem:[#allocation20_spill]] %s1793_s30  ;;  %p2280_p1 = scmp.eq.s32.totalorder %s1927_s12, 0 }
  0x16   : > { %2305 = sst [smem:[#allocation21_spill]] %s1797_s8  ;;  %p236_p2 = scmp.lt.s32.totalorder %s1809_s11, 5 }
  0x17   : > { %s1811_s14 = smov [#allocation9]  }
  0x18   : > { %p1932_p3 = pnand %p1235_p0, %p236_p2  ;;  %s248_s15 = sshll.u32 %s1811_s14, 4  ;;  %s249_s15 = int_to_ptr.vmem [resolvable:$true] %s248_s15 }
  0x19   : > { %s1552_s17 = scalar_lea.vmem %s249_s15, 256  ;;  %p1560_p10 = scmp.lt.s32.totalorder %s249_s15, %s249_s15 }
  0x1a   : > { %s2306_s13 = scalar_select %p1932_p3, 1, 0 }
  0x1b   : > { %p1389_p4 = pneg %p1932_p3  ;;  %p1553_p7 = scmp.ne.s32.totalorder %s249_s15, %s1552_s17 }
  0x1c   : > { %p1561_p11 = scmp.lt.s32.totalorder %s1552_s17, %s1552_s17 }
  0x1d   : > { %p1940_p5 = pnand %p1389_p4, %p2280_p1 }
  0x1e   : > { %p1562_p12 = por %p1561_p11, %p1560_p10 }
  0x1f   : > { %p2292_p6 = pneg %p1940_p5 }
  0x21   : > { %p1555_p8 = pnand %p1553_p7, %p2292_p6 }
  0x23   : > { %p1556_p9 = pneg %p1555_p8 }
  0x25   : > { %p1563_p13 = pnand %p1562_p12, %p1556_p9 }
  0x27   : > { %1566 = shalt.err (!%p1563_p13)
}
  0x28   : > { %s2276_s18 = smov 64   ;;  %s2278_s19 = smov 4  }
  0x29   : > { %s2308_s3 = sld [smem:[#allocation29_spill]]  ;;  %s1234_s22 = sadd.s32 4294967294, %s1809_s11  }
  0x2a   : > { %s36_s23 = sadd.s32 1, %s1801_s9  ;;  %s39_s14 = sadd.s32 1, %s1805_s10 }
  0x2b   : > { %p37_p0 = scmp.ge.s32.totalorder %s36_s23, 2  ;;  %p2281_p2 = scmp.eq.s32.totalorder %s1809_s11, 0 }
  0x2c   : > { %s74_s17 = sadd.s32 1, %s1777_s26  ;;  %p81_p4 = scmp.ne.s32.totalorder %s1777_s26, %s1773_s25 }
  0x2d   : > { %s2362_s23 = smov (%p37_p0, %s36_s23), 0  ;;  %s2364_s14 = smov (!%p37_p0, %s39_s14), %s1805_s10 }
  0x2e   : > { %2309 = sst [smem:[#allocation22_spill]] %s2362_s23  ;;  %s70_s7 = ssub.s32 %s1801_s9, %s2362_s23 }
  0x2f   : > { %1392 = dma.hbm_to_vmem [thread:$0]  (!%p1940_p5), %s2308_s3, 256, %s249_s15, [#allocation10], %s2276_s18, %s2276_s18, %s2278_s19  }
  0x30   : > { %p1971_p7 = por %p81_p4, %p2281_p2  ;;  %p41_p8 = scmp.ge.s32.totalorder %s2364_s14, 2 }
  0x31   : > { %p87_p9 = scmp.ne.s32.totalorder %s1773_s25, %s1769_s24  ;;  %p223_p10 = scmp.eq.s32.totalorder %s1927_s12, 3 }
  0x32   : > { %p229_p11 = scmp.eq.s32.totalorder %s1234_s22, 3  ;;  %s2366_s14 = smov (%p41_p8, %s2364_s14), 0 }
  0x33   : > { %2311 = sst [smem:[#allocation23_spill]] %s2366_s14  ;;  %p1982_p12 = por %p87_p9, %p2280_p1 }
  0x34   : > { %p1986_p13 = por %p223_p10, %p81_p4  ;;  %s1992_s18 = ssub.s32 %s1805_s10, %s2366_s14 }
  0x35   : > { %s2312_s20 = scalar_select %p1982_p12, 1, 0 }
  0x36   : > { %s2314_s21 = scalar_select %p1986_p13, 1, 0 }
  0x37   : > { %2313 = sst [smem:[#allocation24_spill]] %s2312_s20  ;;  %p1994_p0 = por %p229_p11, %p87_p9 }
  0x38   : > { %2315 = sst [smem:[#allocation25_spill]] %s2314_s21  ;;  %s71_s22 = sor.u32 %s70_s7, %s1992_s18 }
  0x39   : > { %s2316_s19 = scalar_select %p1994_p0, 1, 0 }
  0x3a   : > { %p72_p1 = scmp.eq.s32.totalorder %s71_s22, 0  ;;  %p2291_p2 = scmp.lt.s32.totalorder %s1809_s11, 4 }
  0x3b   : > { %2317 = sst [smem:[#allocation26_spill]] %s2316_s19  ;;  %s298_s3 = sand.u32 1, %s1809_s11  }
  0x3c   : > { %s300_s23 = sand.u32 1, %s1777_s26   ;;  %s1241_s21 = sshll.u32 %s1805_s10, 1 }
  0x3d   : > { %s2004_s24 = scalar_select %p72_p1, %s1777_s26, %s74_s17  }
  0x3e   : > { %s1240_s6 = sshll.u32 %s300_s23, 2  ;;  %s307_s14 = sadd.s32 %s1801_s9, %s1241_s21 }
  0x3f   : > { %s302_s30 = scalar_lea.vmem [#allocation6], %s1240_s6  ;;  %s1242_s4 = sshll.u32 %s307_s14, 6 }
  0x40   : > { %s311_s8 = sshll.u32 %s302_s30, 4  ;;  %s2318_s1 = sld [smem:[#allocation28_spill]]  ;;  %s312_s8 = int_to_ptr.vmem [resolvable:$true] %s311_s8 }
  0x41   : > { %p2015_p4 = pnand %p2291_p2, %p1971_p7  ;;  %s1814_s17 = smov [#allocation11]  }
  0x42   : > { %s264_s22 = sshll.u32 %s1814_s17, 4  ;;  %s2019_s23 = scalar_lea.sflag [#allocation7], %s298_s3  ;;  %s265_s22 = int_to_ptr.vmem [resolvable:$true] %s264_s22 }
  0x43   : > { %p1569_p1 = pneg %p2015_p4  ;;  %s1580_s6 = scalar_lea.vmem %s312_s8, 64 }
  0x44   : > { %p1581_p9 = scmp.ne.s32.totalorder %s312_s8, %s1580_s6  ;;  %s1815_s30 = smov [#allocation6]  }
  0x45   : > { %s1585_s25 = sshll.u32 %s1815_s30, 4  ;;  %s1586_s25 = int_to_ptr.vmem [resolvable:$false] %s1585_s25 }
  0x46   : > { %s309_s19 = scalar_lea.hbm %s2318_s1, %s1242_s4  ;;  %p1583_p10 = pnand %p1581_p9, %p1569_p1 }
  0x47   : > { %s1587_s4 = scalar_lea.vmem %s1586_s25, 128  ;;  %p1588_p8 = scmp.lt.s32.totalorder %s312_s8, %s1586_s25 }
  0x48   : > { %p1584_p11 = pneg %p1583_p10  ;;  %p1589_p7 = scmp.lt.s32.totalorder %s1587_s4, %s1580_s6 }
  0x4a   : > { %p1590_p2 = por %p1589_p7, %p1588_p8 }
  0x4c   : > { %p1591_p6 = pnand %p1590_p2, %p1584_p11 }
  0x4e   : > { %1594 = shalt.err (!%p1591_p6)
}
  0x4f   : > { %1402 = dma.hbm_to_vmem [thread:$0]  (!%p2015_p4), %s309_s19, 64, %s312_s8, %s2019_s23  }
  0x50   : > { %s1606_s3 = scalar_lea.vmem %s265_s22, 256  ;;  %p2320_p1 = pneg %p1940_p5 }
  0x51   : > { %p1607_p0 = scmp.ne.s32.totalorder %s265_s22, %s1606_s3  ;;  %p1614_p13 = scmp.lt.s32.totalorder %s265_s22, %s265_s22 }
  0x52   : > { %p1615_p12 = scmp.lt.s32.totalorder %s1606_s3, %s1606_s3 }
  0x53   : > { %p1609_p9 = pnand %p1607_p0, %p2320_p1 }
  0x54   : > { %p1616_p3 = por %p1615_p12, %p1614_p13 }
  0x55   : > { %p1610_p10 = pneg %p1609_p9 }
  0x57   : > { %p1617_p7 = pnand %p1616_p3, %p1610_p10 }
  0x59   : > { %1620 = shalt.err (!%p1617_p7)
}
  0x5a   : > { %s2321_s14 = smov 4   ;;  %s2322_s15 = smov 64  }
  0x5b   : > { %1395 = dma.hbm_to_vmem [thread:$0]  (!%p1940_p5), %s2272_s5, 256, %s265_s22, [#allocation10], %s2322_s15, %s2322_s15, %s2321_s14  }
  0x5c   : > { %s46_s8 = sadd.s32 1, %s1789_s29  ;;  %p53_p3 = scmp.ne.s32.totalorder %s1789_s29, %s1785_s28 }
  0x5d   : > { %p2323_p6 = scmp.eq.s32.totalorder %s1992_s18, 0  ;;  %p2324_p2 = scmp.eq.s32.totalorder %s1809_s11, 0 }
  0x5e   : > { %p59_p13 = scmp.ne.s32.totalorder %s1785_s28, %s1781_s27  ;;  %s281_s19 = sand.u32 1, %s1789_s29  }
  0x5f   : > { %s2043_s16 = scalar_select %p2323_p6, %s1789_s29, %s46_s8  }
  0x60   : > { %p55_p12 = por %p2324_p2, %p53_p3  ;;  %s1239_s7 = sshll.u32 %s1805_s10, 4 }
  0x61   : > { %p2325_p0 = scmp.eq.s32.totalorder %s1927_s12, 0  ;;  %s2327_s0 = sld [smem:[#allocation27_spill]] }
  0x62   : > { %s284_s22 = scalar_lea.vmem [#allocation3], %s281_s19  ;;  %p2328_p5 = scmp.lt.s32.totalorder %s1809_s11, 4 }
  0x63   : > { %p2053_p8 = por %p2325_p0, %p59_p13  ;;  %s291_s4 = sshll.u32 %s284_s22, 4  ;;  %s292_s4 = int_to_ptr.vmem [resolvable:$true] %s291_s4 }
  0x64   : > { %p2062_p4 = pnand %p2328_p5, %p55_p12  ;;  %s1243_s27 = sshll.u32 %s281_s19, 3 }
  0x65   : > { %s282_s3 = scalar_lea.sflag [#allocation4], %s281_s19  ;;  %s1634_s20 = scalar_lea.vmem %s292_s4, 16 }
  0x66   : > { %p1623_p11 = pneg %p2062_p4  ;;  %p1635_p1 = scmp.ne.s32.totalorder %s292_s4, %s1634_s20 }
  0x67   : > { %s289_s25 = scalar_lea.hbm %s2327_s0, %s1239_s7  ;;  %s1816_s21 = smov [#allocation3]  }
  0x68   : > { %p1637_p9 = pnand %p1635_p1, %p1623_p11  ;;  %s1639_s8 = sshll.u32 %s1816_s21, 4  ;;  %s1640_s8 = int_to_ptr.vmem [resolvable:$false] %s1639_s8 }
  0x69   : > { %s1641_s7 = scalar_lea.vmem %s1640_s8, 32  ;;  %p1642_p7 = scmp.lt.s32.totalorder %s292_s4, %s1640_s8 }
  0x6a   : > { %p1638_p10 = pneg %p1637_p9  ;;  %p1643_p3 = scmp.lt.s32.totalorder %s1641_s7, %s1634_s20 }
  0x6c   : > { %p1644_p6 = por %p1643_p3, %p1642_p7 }
  0x6e   : > { %p1645_p2 = pnand %p1644_p6, %p1638_p10 }
  0x70   : > { %1648 = shalt.err (!%p1645_p2)
}
  0x71   : > { %1399 = dma.hbm_to_vmem [thread:$0]  (!%p2062_p4), %s289_s25, 16, %s292_s4, %s282_s3  }
  0x72   : > { %s322_s19 = scalar_lea.vmem [#allocation8], %s1243_s27  ;;  %s1275_s30 = sshll.u32 %s1805_s10, 7 }
  0x73   : > { %s329_s6 = sshll.u32 %s322_s19, 4  ;;  %s328_s21 = scalar_lea.hbm %s2269_s2, %s1275_s30  ;;  %s330_s6 = int_to_ptr.vmem [resolvable:$true] %s329_s6 }
  0x74   : > { %s1662_s1 = scalar_lea.vmem %s330_s6, 128  ;;  %s1817_s20 = smov [#allocation8]  }
  0x75   : > { %p1663_p12 = scmp.ne.s32.totalorder %s330_s6, %s1662_s1  ;;  %s1667_s8 = sshll.u32 %s1817_s20, 4  ;;  %s1668_s8 = int_to_ptr.vmem [resolvable:$false] %s1667_s8 }
  0x76   : > { %s1669_s7 = scalar_lea.vmem %s1668_s8, 256  ;;  %p1670_p5 = scmp.lt.s32.totalorder %s330_s6, %s1668_s8 }
  0x77   : > { %p1665_p13 = pnand %p1663_p12, %p1623_p11  ;;  %p1671_p1 = scmp.lt.s32.totalorder %s1669_s7, %s1662_s1 }
  0x79   : > { %p1666_p0 = pneg %p1665_p13  ;;  %p1672_p9 = por %p1671_p1, %p1670_p5 }
  0x7b   : > { %p1673_p10 = pnand %p1672_p9, %p1666_p0 }
  0x7d   : > { %1676 = shalt.err (!%p1673_p10)
}
  0x7e   : > { %1405 = dma.hbm_to_vmem [thread:$0]  (!%p2062_p4), %s328_s21, 128, %s330_s6, %s2019_s23, %s2322_s15, %s2322_s15, %s2321_s14  }
  0x7f   : > { %p2330_p7 = scmp.ne.s32.totalorder %s2306_s13, 0 }
  0x80   : > { %s2089_s0 = sand.u32 (!%p2330_p7), 1, %s1785_s28  }
  0x81   : > { %341 = sbr.rel (%p2330_p7) target bundleno = 1689 (0x699), region = 48  ;;  %s344_s1 = scalar_lea.sflag (!%p2330_p7), [#allocation4], %s2089_s0 }
  0x82   : > { %s346_s25 = scalar_lea.vmem (!%p2330_p7), [#allocation3], %s2089_s0 }
  0x86   : > { %1748 = dma.done.wait (%p2053_p8), %s344_s1, 16  }
  0x87   : > { %1750 = vsyncadd (%p2053_p8), %s344_s1, 4294967280  ;;  %s2331_s4 = sld [smem:[#allocation19_spill]]  ;;  %s351_s23 = sand.u32 1, %s1927_s12  }
  0x88   : > { %s2332_s18 = sld [smem:[#allocation24_spill]]  ;;  %s352_s15 = scalar_lea.sflag [#allocation7], %s351_s23 }
  0x8d   : > { %s2099_s14 = sand.u32 1, %s2331_s4  }
  0x8e   : > { %s1247_s13 = sshll.u32 %s2099_s14, 2  ;;  %p2333_p4 = scmp.ne.s32.totalorder %s2332_s18, 0 }
  0x8f   : > { %s355_s27 = scalar_lea.vmem [#allocation6], %s1247_s13 }
  0x90   : > { %1752 = dma.done.wait (%p2333_p4), %s352_s15, 64  }
  0x91   : > { %1754 = vsyncadd (%p2333_p4), %s352_s15, 4294967232  ;;  %s1248_s3 = sshll.u32 %s2089_s0, 3 }
  0x92   : > { %s364_s19 = scalar_lea.vmem [#allocation8], %s1248_s3 }
  0x93   : > { %1756 = dma.done.wait (%p2053_p8), %s352_s15, 128  }
  0x94   : > { %1758 = vsyncadd (%p2053_p8), %s352_s15, 4294967168  ;;  %p2334_p11 = scmp.eq.s32.totalorder %s1927_s12, 0 }
  0x96   : > { %1760 = dma.done.wait (%p2334_p11), [#allocation10], 512   ;;  %p2335_p3 = pmov %p2334_p11 }
  0x97   : > { %v1818_v0 = vmov 0.0   ;;  %vm1819_vm0 = vmmov 0   ;;  %v1520_v1 = vld [vmem:[#allocation9 + $0x8] sm:$0xff]   ;;  %s1820_s17 = smov 96   ;;  %v1521_v2 = vld [vmem:[#allocation9] sm:$0xff]   ;;  %s2336_s30 = sld [smem:[#allocation30_spill]]  ;;  %v548_v33 = vlaneseq }
  0x98   : > { %1762 = vsyncadd (%p2335_p3), [#allocation10], 4294966784  ;;  %1309 = vmatprep.subr.bf16.mxu1 %v1818_v0  ;;  %1301 = vmatprep.subr.bf16.mxu0 %v1818_v0  ;;  %v418_v4 = vld [vmem:[%s355_s27] sm:$0xf]  ;;  %vm437_vm1 = vcmask 261120   ;;  %v1522_v7 = vld [vmem:[%s364_s19] sm:$0xff]  }
  0x99   : > { %1313 = vmatprep.mubr.msk.bf16.mxu1 %vm1819_vm0, %v1818_v0  ;;  %1305 = vmatprep.mubr.msk.bf16.mxu0 %vm1819_vm0, %v1818_v0  ;;  %s1821_s22 = smov 120   ;;  %s1822_s21 = smov 112   ;;  %vm553_vm2 = vcmask 64512   ;;  %v544_v34 = vld [vmem:[%s346_s25] sm:$0x1]  ;;  %v549_v35 = vshrl.u32 %v548_v33, 7 }
  0x9a   : > { %491 = vrot.lane.b32.xlu0 %v1520_v1, %s1820_s17  ;;  %1302 = vmatpush3.bf16.msra.mxu0 %v1520_v1  ;;  %s1823_s20 = smov 104   ;;  %vm545_vm3 = vcmp.eq.f32.partialorder %v544_v34, 0.0  ;;  %vm600_vm4 = vcmask 130048   ;;  %s1824_s8 = smov 88   ;;  %vm774_vm5 = vcmask 130112   ;;  %vm888_vm6 = vcmask 195712  }
  0x9b   : > { %1303 = vmatprep.subr.bf16.mxu0 %v1818_v0  ;;  %v550_v36 = vsub.s32 0, %v549_v35  ;;  %v546_v37 = vsel %vm545_vm3, -1e+09, %v1818_v0  ;;  %s1825_s7 = smov 72   ;;  %s1826_s0 = smov 80   ;;  %vm1002_vm7 = vcmask 261312  }
  0x9c   : > { %s1827_s1 = smov 8   ;;  %s1828_s25 = smov 16  }
  0x9d   : > { %v1252_v3 = vld [vmem:[%s2336_s30] ss:$0 sm:$0xff]  ;;  %v551_v38 = vrot.slane %v546_v37, %v550_v36  ;;  %s1829_s4 = smov 24   ;;  %s2337_s18 = sld [smem:[#allocation21_spill]] }
  0x9e   : > { %495 = vrot.lane.b32.xlu1 %v1252_v3, %s1820_s17  ;;  %489 = vrot.lane.b32.xlu0 %v1521_v2, %s1820_s17  ;;  %s2338_s23 = sld [smem:[#allocation20_spill]]  ;;  %s1251_s13 = sshll.u32 %s2099_s14, 3 }
  0x9f   : > { %1304 = vmatpush3.bf16.msra.mxu0 %v1521_v2  ;;  %s2339_s27 = sld [smem:[#allocation25_spill]]  ;;  %s411_s30 = scalar_lea.vmem [#allocation12], %s1251_s13 }
  0xa0   : > { %1317 = vmatprep.subr.bf16.mxu0 %v1818_v0  ;;  %s2340_s12 = sld [smem:[#allocation31_spill]] }
  0xa2   : > { %1306 = vmatmul.mubr.msk.bf16.vlgmr.msra.gmra.mxu0 %vm437_vm1, %v418_v4 }
  0xa3   : > { %1319 = vmatprep.mubr.msk.bf16.mxu0 %vm1819_vm0, %v1818_v0  ;;  %s1271_s15 = sshll.u32 %s2337_s18, 1 }
  0xa4   : > { %s1085_s3 = sadd.s32 %s2338_s23, %s1271_s15 }
  0xa5   : > { %s1272_s6 = sshll.u32 %s1085_s3, 7  ;;  %p2343_p6 = scmp.ne.s32.totalorder %s2339_s27, 0 }
 0x10c   : > { %v492_v5 = vpop.permute.xlu0 %491 }
 0x10d   : > { %1310 = vmatpush3.bf16.msra.mxu1 %v492_v5 }
 0x10e   : > { %1311 = vmatprep.subr.bf16.mxu1 %v1818_v0 }
 0x110   : > { %v490_v6 = vpop.permute.xlu0 %489  ;;  %v496_v16 = vpop.permute.xlu1 %495 }
 0x111   : > { %1312 = vmatpush3.bf16.msra.mxu1 %v490_v6 }
 0x112   : > { %1323 = vmatprep.subr.bf16.mxu1 %v1818_v0 }
 0x114   : > { %1314 = vmatmul.mubr.msk.bf16.vlgmr.msra.gmra.mxu1 %vm437_vm1, %v1522_v7 }
 0x115   : > { %1325 = vmatprep.mubr.msk.bf16.mxu1 %vm1819_vm0, %v1818_v0 }
 0x162   : > { %v475_v8 = vpop.f32.mrf.mxu0 }
 0x163   : > { %v476_v9 = vadd.f32 %v1252_v3, %v475_v8 }
 0x164   : > { %v1307_v10 = vpop.f32.mrf.mxu0 }
 0x165   : > { %v481_v11 = vmul.f32 0.35355338, %v476_v9 }
 0x166   : > { %v478_v12 = vpop.f32.mrf.mxu0 }
 0x167   : > { %v542_v13 = vpack.c.bf16 %v481_v11, %v481_v11 }
 0x168   : > { %v1308_v14 = vpop.f32.mrf.mxu0 }
 0x169   : > { %662 = vrot.lane.b32.xlu0 %v542_v13, %s1821_s22 }
 0x16d   : > { %776 = vrot.lane.b32.xlu0 %v542_v13, %s1822_s21 }
 0x171   : > { %890 = vrot.lane.b32.xlu0 %v542_v13, %s1823_s20 }
 0x1d4   : > { %v535_v15 = vpop.f32.mrf.mxu1 }
 0x1d5   : > { %v536_v19 = vadd.f32 %v535_v15, %v496_v16 }
 0x1d6   : > { %v1315_v17 = vpop.f32.mrf.mxu1 }
 0x1d8   : > { %v538_v18 = vpop.f32.mrf.mxu1 }
 0x1d9   : > { %v539_v20 = vadd.f32 %v538_v18, %v496_v16 }
 0x1da   : > { %v1316_v21 = vpop.f32.mrf.mxu1 }
 0x1db   : > { %v2137_v22 = vpack.c.bf16 %v539_v20, %v536_v19  ;;  %v663_v27 = vpop.permute.xlu0 %662 }
 0x1dd   : > { %664 = vrot.lane.b32.xlu1 %v2137_v22, %s1821_s22  ;;  %v558_v23 = vsel %vm553_vm2, %v2137_v22, 0  ;;  %s1089_s22 = sshll.u32 %s411_s30, 4  ;;  %s2206_s22 = int_to_ptr.vmem [resolvable:$true] %s1089_s22 }
 0x1de   : > { %1318 = vmatpush3.bf16.xpose.msra.mxu0 %v558_v23 }
 0x1df   : > { %1329 = vmatprep.subr.bf16.mxu0 %v1818_v0  ;;  %v777_v30 = vpop.permute.xlu0 %776 }
 0x1e1   : > { %778 = vrot.lane.b32.xlu1 %v2137_v22, %s1822_s21 }
 0x1e3   : > { %v891_v32 = vpop.permute.xlu0 %890 }
 0x1e5   : > { %892 = vrot.lane.b32.xlu1 %v2137_v22, %s1823_s20  ;;  %1320 = vmatmul.mubr.msk.bf16.vlgmr.msra.gmra.mxu0 %vm553_vm2, %v542_v13 }
 0x1e6   : > { %1331 = vmatprep.mubr.msk.bf16.mxu0 %vm1819_vm0, %v1818_v0 }
 0x24f   : > { %v665_v24 = vpop.permute.xlu1 %664 }
 0x250   : > { %v670_v25 = vsel %vm553_vm2, %v665_v24, 0 }
 0x251   : > { %1330 = vmatpush3.bf16.xpose.msra.mxu0 %v670_v25 }
 0x252   : > { %1341 = vmatprep.subr.bf16.mxu0 %v1818_v0 }
 0x253   : > { %v779_v26 = vpop.permute.xlu1 %778 }
 0x254   : > { %v784_v28 = vsel %vm553_vm2, %v779_v26, 0 }
 0x257   : > { %v893_v29 = vpop.permute.xlu1 %892 }
 0x258   : > { %1332 = vmatmul.mubr.msk.bf16.vlgmr.msra.gmra.mxu0 %vm553_vm2, %v663_v27  ;;  %v898_v31 = vsel %vm553_vm2, %v893_v29, 0 }
 0x259   : > { %1342 = vmatpush3.bf16.xpose.msra.mxu0 %v784_v28  ;;  %1343 = vmatprep.mubr.msk.bf16.mxu0 %vm1819_vm0, %v1818_v0 }
 0x25a   : > { %1353 = vmatprep.subr.bf16.mxu0 %v1818_v0 }
 0x260   : > { %1344 = vmatmul.mubr.msk.bf16.vlgmr.msra.gmra.mxu0 %vm553_vm2, %v777_v30 }
 0x261   : > { %1354 = vmatpush3.bf16.xpose.msra.mxu0 %v898_v31  ;;  %1355 = vmatprep.mubr.msk.bf16.mxu0 %vm1819_vm0, %v1818_v0 }
 0x262   : > { %1365 = vmatprep.subr.bf16.mxu0 %v1818_v0 }
 0x268   : > { %1356 = vmatmul.mubr.msk.bf16.vlgmr.msra.gmra.mxu0 %vm553_vm2, %v891_v32 }
 0x269   : > { %1369 = vmatprep.mubr.msk.bf16.mxu0 %vm1819_vm0, %v1818_v0 }
 0x2a5   : > { %v594_v39 = vpop.f32.mrf.mxu0 }
 0x2a6   : > { %v595_v40 = vadd.f32 %v594_v39, %v551_v38 }
 0x2a7   : > { %v1321_v41 = vpop.f32.mrf.mxu0 }
 0x2a8   : > { %v601_v42 = vsel %vm600_vm4, %v595_v40, -inf }
 0x2a9   : > { %602 = vmax.xlane.f32.xlu1 %v601_v42  ;;  %v597_v43 = vpop.f32.mrf.mxu0 }
 0x2ab   : > { %v1322_v44 = vpop.f32.mrf.mxu0 }
 0x318   : > { %v706_v45 = vpop.f32.mrf.mxu0 }
 0x319   : > { %v707_v46 = vadd.f32 %v706_v45, %v551_v38 }
 0x31a   : > { %v1333_v47 = vpop.f32.mrf.mxu0 }
 0x31b   : > { %v712_v48 = vsel %vm600_vm4, %v707_v46, -inf }
 0x31c   : > { %713 = vmax.xlane.f32.xlu0 %v712_v48  ;;  %v709_v49 = vpop.f32.mrf.mxu0  ;;  %v1523_v48 = vld [vmem:[#allocation11 + $0x8] sm:$0xff]  }
 0x31d   : > { %1366 = vmatpush3.bf16.msra.mxu0 %v1523_v48 }
 0x31e   : > { %v1334_v50 = vpop.f32.mrf.mxu0  ;;  %1367 = vmatprep.subr.bf16.mxu0 %v1818_v0 }
 0x31f   : > { %v1524_v50 = vld [vmem:[#allocation11] sm:$0xff]  }
 0x320   : > { %v820_v51 = vpop.f32.mrf.mxu0 }
 0x321   : > { %v821_v52 = vadd.f32 %v820_v51, %v551_v38  ;;  %1368 = vmatpush3.bf16.msra.mxu0 %v1524_v50 }
 0x322   : > { %v1345_v53 = vpop.f32.mrf.mxu0 }
 0x323   : > { %v826_v54 = vsel %vm600_vm4, %v821_v52, -inf }
 0x324   : > { %827 = vmax.xlane.f32.xlu0 %v826_v54  ;;  %v823_v55 = vpop.f32.mrf.mxu0 }
 0x326   : > { %v1346_v56 = vpop.f32.mrf.mxu0 }
 0x328   : > { %v934_v57 = vpop.f32.mrf.mxu0 }
 0x329   : > { %v935_v58 = vadd.f32 %v934_v57, %v551_v38 }
 0x32a   : > { %v1357_v59 = vpop.f32.mrf.mxu0 }
 0x32b   : > { %v940_v60 = vsel %vm600_vm4, %v935_v58, -inf }
 0x32c   : > { %941 = vmax.xlane.f32.xlu1 %v940_v60  ;;  %v937_v61 = vpop.f32.mrf.mxu0 }
 0x32e   : > { %v1358_v62 = vpop.f32.mrf.mxu0 }
 0x32f   : > { %v1266_v62 = vld [vmem:[%s2340_s12] ss:$0 sm:$0xff] }
 0x332   : > { %v603_v63 = vpop.xlane.xlu1 %602 }
 0x333   : > { %v604_v1 = vsub.f32 %v595_v40, %v603_v63 }
 0x335   : > { %v605_v2 = vmul.f32 1.442695, %v604_v1 }
 0x337   : > { %1525 = vpow2.f32 %v605_v2 }
 0x344   : > { %v1526_v3 = vpop.eup %1525 }
 0x345   : > { %v607_v4 = vsel %vm600_vm4, %v1526_v3, 0.0 }
 0x346   : > { %608 = vadd.xlane.f32.xlu0 %v607_v4 }
 0x3a5   : > { %v714_v5 = vpop.xlane.xlu0 %713 }
 0x3a6   : > { %v715_v6 = vsub.f32 %v707_v46, %v714_v5 }
 0x3a8   : > { %v716_v7 = vmul.f32 1.442695, %v715_v6 }
 0x3aa   : > { %1527 = vpow2.f32 %v716_v7 }
 0x3ad   : > { %v828_v8 = vpop.xlane.xlu0 %827 }
 0x3ae   : > { %v829_v9 = vsub.f32 %v821_v52, %v828_v8 }
 0x3b0   : > { %v830_v10 = vmul.f32 1.442695, %v829_v9 }
 0x3b2   : > { %1529 = vpow2.f32 %v830_v10 }
 0x3b5   : > { %v942_v15 = vpop.xlane.xlu1 %941 }
 0x3b6   : > { %v943_v16 = vsub.f32 %v935_v58, %v942_v15 }
 0x3b7   : > { %v1528_v11 = vpop.eup %1527 }
 0x3b8   : > { %v718_v12 = vsel %vm600_vm4, %v1528_v11, 0.0  ;;  %v944_v17 = vmul.f32 1.442695, %v943_v16 }
 0x3b9   : > { %719 = vadd.xlane.f32.xlu1 %v718_v12 }
 0x3ba   : > { %1531 = vpow2.f32 %v944_v17 }
 0x3bf   : > { %v1530_v13 = vpop.eup %1529 }
 0x3c0   : > { %v832_v14 = vsel %vm600_vm4, %v1530_v13, 0.0 }
 0x3c1   : > { %833 = vadd.xlane.f32.xlu0 %v832_v14 }
 0x3c7   : > { %v1532_v18 = vpop.eup %1531 }
 0x3c8   : > { %v946_v19 = vsel %vm600_vm4, %v1532_v18, 0.0 }
 0x3ca   : > { %724 = vrot.lane.b32.xlu1 %v2137_v22, %s1824_s8  ;;  %s2341_s8 = sld [smem:[#allocation32_spill]] }
 0x3cf   : > { %v609_v20 = vpop.xlane.xlu0 %608 }
 0x3d0   : > { %1533 = vrcp.f32 %v609_v20 }
 0x3d7   : > { %614 = vrot.lane.b32.xlu0 %v2137_v22, %s1820_s17 }
 0x3db   : > { %952 = vrot.lane.b32.xlu0 %v2137_v22, %s1825_s7  ;;  %s2342_s7 = smov %s2341_s8 }
 0x3dd   : > { %v1534_v23 = vpop.eup %1533 }
 0x3de   : > { %v611_v25 = vmul.f32 %v1534_v23, %v1526_v3 }
 0x3e0   : > { %v612_v27 = vpack.c.bf16 %v611_v25, %v611_v25 }
 0x3ee   : > { %947 = vadd.xlane.f32.xlu1 %v946_v19 }
 0x3ff   : > { %838 = vrot.lane.b32.xlu1 %v2137_v22, %s1826_s0  ;;  %s2204_s0 = scalar_lea.hbm %s2341_s8, %s1272_s6 }
 0x442   : > { %v720_v21 = vpop.xlane.xlu1 %719 }
 0x443   : > { %1535 = vrcp.f32 %v720_v21 }
 0x446   : > { %v725_v29 = vpop.permute.xlu1 %724 }
 0x44a   : > { %v834_v24 = vpop.xlane.xlu0 %833 }
 0x44b   : > { %1537 = vrcp.f32 %v834_v24 }
 0x44e   : > { %v615_v26 = vpop.permute.xlu0 %614 }
 0x44f   : > { %1324 = vmatpush3.bf16.msra.mxu1 %v615_v26 }
 0x450   : > { %1335 = vmatprep.subr.bf16.mxu1 %v1818_v0  ;;  %v1536_v28 = vpop.eup %1535 }
 0x451   : > { %v722_v22 = vmul.f32 %v1536_v28, %v1528_v11 }
 0x452   : > { %1326 = vmatmul.mubr.msk.bf16.vlgmr.msra.gmra.mxu1 %vm600_vm4, %v612_v27  ;;  %v953_v36 = vpop.permute.xlu0 %952 }
 0x453   : > { %1336 = vmatpush3.bf16.msra.mxu1 %v725_v29  ;;  %1337 = vmatprep.mubr.msk.bf16.mxu1 %vm1819_vm0, %v1818_v0  ;;  %v723_v30 = vpack.c.bf16 %v722_v22, %v722_v22 }
 0x454   : > { %1347 = vmatprep.subr.bf16.mxu1 %v1818_v0 }
 0x458   : > { %v1538_v31 = vpop.eup %1537 }
 0x459   : > { %v836_v33 = vmul.f32 %v1538_v31, %v1530_v13 }
 0x45a   : > { %1338 = vmatmul.mubr.msk.bf16.vlgmr.msra.gmra.mxu1 %vm600_vm4, %v723_v30 }
 0x45b   : > { %1349 = vmatprep.mubr.msk.bf16.mxu1 %vm1819_vm0, %v1818_v0  ;;  %v837_v35 = vpack.c.bf16 %v836_v33, %v836_v33 }
 0x477   : > { %v948_v32 = vpop.xlane.xlu1 %947 }
 0x478   : > { %1539 = vrcp.f32 %v948_v32 }
 0x47b   : > { %v839_v34 = vpop.permute.xlu1 %838 }
 0x47c   : > { %1348 = vmatpush3.bf16.msra.mxu1 %v839_v34 }
 0x47d   : > { %1359 = vmatprep.subr.bf16.mxu1 %v1818_v0 }
 0x47f   : > { %1350 = vmatmul.mubr.msk.bf16.vlgmr.msra.gmra.mxu1 %vm600_vm4, %v837_v35 }
 0x480   : > { %1360 = vmatpush3.bf16.msra.mxu1 %v953_v36  ;;  %1361 = vmatprep.mubr.msk.bf16.mxu1 %vm1819_vm0, %v1818_v0 }
 0x485   : > { %v1540_v37 = vpop.eup %1539 }
 0x486   : > { %v950_v38 = vmul.f32 %v1540_v37, %v1532_v18 }
 0x488   : > { %v951_v39 = vpack.c.bf16 %v950_v38, %v950_v38 }
 0x48a   : > { %1362 = vmatmul.mubr.msk.bf16.vlgmr.msra.gmra.mxu1 %vm600_vm4, %v951_v39 }
 0x512   : > { %v654_v40 = vpop.f32.mrf.mxu1 }
 0x513   : > { %660 = vst.msk [vmem:[#allocation2] sm:$0xff] %vm553_vm2, %v654_v40 }
 0x514   : > { %v1327_v41 = vpop.f32.mrf.mxu1 }
 0x516   : > { %v657_v42 = vpop.f32.mrf.mxu1 }
 0x518   : > { %v1328_v43 = vpop.f32.mrf.mxu1 }
 0x51a   : > { %v764_v44 = vpop.f32.mrf.mxu1 }
 0x51b   : > { %771 = vrot.lane.b32.xlu1 %v764_v44, %s1827_s1  ;;  %s1074_s1 = scalar_lea.sflag [#allocation5], %s2099_s14 }
 0x51c   : > { %v1339_v45 = vpop.f32.mrf.mxu1 }
 0x51e   : > { %v767_v46 = vpop.f32.mrf.mxu1 }
 0x520   : > { %v1340_v47 = vpop.f32.mrf.mxu1 }
 0x53f   : > { %v878_v49 = vpop.f32.mrf.mxu1 }
 0x540   : > { %885 = vrot.lane.b32.xlu0 %v878_v49, %s1828_s25  ;;  %s1677_s25 = scalar_lea.vmem %s2206_s22, 128 }
 0x541   : > { %v1351_v51 = vpop.f32.mrf.mxu1  ;;  %p1678_p8 = scmp.ne.s32.totalorder %s2206_s22, %s1677_s25 }
 0x543   : > { %v881_v52 = vpop.f32.mrf.mxu1  ;;  %p1679_p2 = pnand %p1678_p8, %p2343_p6 }
 0x545   : > { %v1352_v53 = vpop.f32.mrf.mxu1  ;;  %p1680_p12 = pneg %p1679_p2 }
 0x54a   : > { %v992_v54 = vpop.f32.mrf.mxu1 }
 0x54b   : > { %999 = vrot.lane.b32.xlu1 %v992_v54, %s1829_s4  ;;  %s1830_s4 = smov [#allocation12]  }
 0x54c   : > { %v1363_v55 = vpop.f32.mrf.mxu1  ;;  %s1681_s18 = sshll.u32 %s1830_s4, 4  ;;  %s1682_s18 = int_to_ptr.vmem [resolvable:$false] %s1681_s18 }
 0x54d   : > { %s1683_s23 = scalar_lea.vmem %s1682_s18, 256  ;;  %p1684_p13 = scmp.lt.s32.totalorder %s2206_s22, %s1682_s18 }
 0x54e   : > { %v995_v56 = vpop.f32.mrf.mxu1  ;;  %p1685_p0 = scmp.lt.s32.totalorder %s1683_s23, %s1677_s25 }
 0x550   : > { %v1364_v57 = vpop.f32.mrf.mxu1  ;;  %p1686_p5 = por %p1685_p0, %p1684_p13 }
 0x552   : > { %p1687_p1 = pnand %p1686_p5, %p1680_p12 }
 0x58d   : > { %v772_v58 = vpop.permute.xlu1 %771 }
 0x58e   : > { %775 = vst.msk [vmem:[#allocation2] sm:$0xff] %vm774_vm5, %v772_v58 }
 0x5b2   : > { %v886_v59 = vpop.permute.xlu0 %885 }
 0x5b3   : > { %889 = vst.msk [vmem:[#allocation2] sm:$0xff] %vm888_vm6, %v886_v59 }
 0x5bd   : > { %v1000_v0 = vpop.permute.xlu1 %999 }
 0x5be   : > { %1003 = vst.msk [vmem:[#allocation2] sm:$0xff] %vm1002_vm7, %v1000_v0 }
 0x5c5   : > { %v1004_v60 = vld [vmem:[#allocation2] sm:$0xff] }
 0x5c6   : > { %v1005_v61 = vpack.c.bf16 %v1004_v60, %v1004_v60 }
 0x5c8   : > { %1370 = vmatmul.mubr.msk.bf16.vlgmr.msra.gmra.mxu0 %vm437_vm1, %v1005_v61 }
 0x688   : > { %v1066_v63 = vpop.f32.mrf.mxu0 }
 0x689   : > { %v1067_v1 = vadd.f32 %v1266_v62, %v1066_v63 }
 0x68a   : > { %v1371_v2 = vpop.f32.mrf.mxu0 }
 0x68b   : > { %1072 = vst.msk [vmem:[%s411_s30] sm:$0xff] %vm437_vm1, %v1067_v1 }
 0x68c   : > { %v1069_v3 = vpop.f32.mrf.mxu0 }
 0x68d   : > { %1690 = shalt.err (!%p1687_p1)
}
 0x68e   : > { %s1691_s13 = scalar_lea.hbm %s2204_s0, 128  ;;  %s1695_s3 = scalar_lea.hbm %s2342_s7, 512 }
 0x68f   : > { %p1692_p9 = scmp.ne.s32.totalorder %s2204_s0, %s1691_s13  ;;  %p1696_p4 = scmp.lt.s32.totalorder %s2204_s0, %s2342_s7 }
 0x690   : > { %p1697_p11 = scmp.lt.s32.totalorder %s1695_s3, %s1691_s13 }
 0x691   : > { %p1693_p10 = pnand %p1692_p9, %p2343_p6 }
 0x692   : > { %p1698_p3 = por %p1697_p11, %p1696_p4 }
 0x693   : > { %p1694_p7 = pneg %p1693_p10 }
 0x695   : > { %p1699_p8 = pnand %p1698_p3, %p1694_p7 }
 0x697   : > { %1702 = shalt.err (!%p1699_p8)
}
 0x698   : > { %1387 = dma.vmem_to_hbm [thread:$0]  (%p2343_p6), %s2206_s22, 128, %s2204_s0, %s1074_s1   ;;  %v1372_v4 = vpop.f32.mrf.mxu0 }
 0x699 PF: > { %s2344_s12 = sld [smem:[#allocation18_spill]]  ;;  %p1415_p2 = scmp.ge.s32.totalorder %s1809_s11, 2 }
 0x69a   : > { %s2345_s6 = sld [smem:[#allocation26_spill]] }
 0x69f   : > { %s1101_s30 = sand.u32 1, %s2344_s12  }
 0x6a0   : > { %p2346_p12 = scmp.ne.s32.totalorder %s2345_s6, 0  ;;  %s1102_s21 = scalar_lea.sflag [#allocation5], %s1101_s30 }
 0x6a2   : > { %p1407_p13 = pnand %p1415_p2, %p2346_p12 }
 0x6a4   : > { %p1408_p0 = pneg %p1407_p13 }
 0x6a6   : > { %1764 = dma.done.wait (%p1408_p0), %s1102_s21, 128  }
 0x6a7   : > { %1766 = vsyncadd (%p1408_p0), %s1102_s21, 4294967168  ;;  %s27_s11 = sadd.s32 1, %s1809_s11   ;;  %s2347_s27 = sld [smem:[#allocation19_spill]] }
 0x6a8   : > { %p24_p5 = scmp.ge.s32.totalorder %s27_s11, 6   ;;  %s2348_s20 = smov %s2004_s24 }
 0x6a9   : > { %s2349_s22 = sld [smem:[#allocation22_spill]]  ;;  %s2352_s25 = smov %s1777_s26 }
 0x6aa   : > { %s2350_s0 = sld [smem:[#allocation23_spill]]  ;;  %s2353_s26 = smov %s2348_s20 }
 0x6ab   : > { %s2357_s30 = smov %s1801_s9  ;;  %s2358_s8 = smov %s1805_s10 }
 0x6ac   :  { %26 = sbr.rel (!%p24_p5) target bundleno = 19 (0x13), region = 125 }
 0x6ad   : > { %s2351_s24 = smov %s2347_s27  ;;  %s2354_s27 = smov %s1785_s28 }
 0x6ae   : > { %s2355_s28 = smov %s1789_s29  ;;  %s2356_s29 = smov %s2043_s16 }
 0x6af   : > { %s2359_s9 = smov %s2349_s22 }
 0x6b0   : > { %s2360_s10 = smov %s2350_s0 }
 0x6b1   :  { %1107 = vsyncpa [#allocation4], 1 }
 0x6b2   :  { %1109 = vsyncpa [#allocation4 + $0x1], 1 }
 0x6b3   :  { %1110 = vsyncpa [#allocation7], 1 }
 0x6b4   :  { %1112 = vsyncpa [#allocation7 + $0x1], 1 }
 0x6b5   :  { %1113 = vsyncpa [#allocation10], 1 }
 0x6b6   :  { %1114 = vsyncpa [#allocation5], 1 }
 0x6b7   :  { %1116 = vsyncpa [#allocation5 + $0x1], 1 }

</bundles_post_ra>
